<compile_context>
chip_gen: v7x
topology: tpu7x:2x2x1
jax: 0.10.0
libtpu: 0.0.40
codegen_flags: <defaults>
</compile_context>

<pallas_src>
import jax
import jax.numpy as jnp
from jax.experimental import pallas as pl
from jax.experimental.pallas import tpu as pltpu


# ----------------------------------------------------------------------------
# Fused Pallas kernel over one pixel tile:
#   conv2(+BN+ReLU) -> conv3a(+BN+ReLU, xt pre-activation already folded in)
#   -> conv3b(+BN+ReLU)
# All weights stay VMEM-resident (index_map -> (0,0)); the 48-channel conv2
# result and the channel concat never touch HBM (the concat is a sum of the
# upsampled xt pre-activation and the xl-branch matmul).
# ----------------------------------------------------------------------------
def _fused_decoder_kernel(g_ref, xl_ref, w2_ref, b2_ref, w3l_ref, b3a_ref,
                          w3b_ref, b3b_ref, o_ref):
    # conv2 + BN + ReLU : stays in VMEM/vregs.
    l = jnp.dot(xl_ref[...], w2_ref[...], preferred_element_type=jnp.float32)
    l = jnp.maximum(l + b2_ref[...], 0.0)

    # conv3a on concat([xt_up, l]) == (upsampled xt @ w3t) + l @ w3l + b3a.
    # The xt term arrives precomputed (commuted with the upsample) in g_ref.
    a = g_ref[...].astype(jnp.float32)
    a = a + jnp.dot(l.astype(w3l_ref.dtype), w3l_ref[...],
                    preferred_element_type=jnp.float32)
    a = jnp.maximum(a + b3a_ref[...], 0.0)

    # conv3b + BN + ReLU
    b = jnp.dot(a.astype(w3b_ref.dtype), w3b_ref[...],
                preferred_element_type=jnp.float32)
    o_ref[...] = jnp.maximum(b + b3b_ref[...], 0.0).astype(o_ref.dtype)


def _choose_tile(P):
    # Large tiles amortize the ~0.35 us per-grid-step overhead and keep the
    # MXU pipeline full; keep >= 2 grid steps so the "parallel" axis can shard
    # across v7x's two TensorCores.
    for tm in (2048, 1024, 512, 256, 128, 64, 32, 16, 8):
        if P >= 2 * tm:
            return tm
    return 8


def fused_decoder_convs(g_up, xl_flat, w2s, b2, w3l, b3a, w3b, b3b):
    """g_up: (P, Cm) bf16 upsampled xt pre-activation, xl_flat: (P, C2) bf16.

    Weights bf16 (BN scale folded), shift vectors f32.  Returns (P, Cout) bf16.
    """
    P, Cm = g_up.shape
    C2 = xl_flat.shape[1]
    C48 = w2s.shape[1]
    Cout = w3b.shape[1]

    tm = _choose_tile(P)
    grid = (pl.cdiv(P, tm),)

    flops = 2 * P * (C2 * C48 + C48 * Cm + Cm * Cout)
    bytes_accessed = (P * (Cm + C2 + Cout) * 2          # bf16 activations
                      + (C2 * C48 + C48 * Cm + Cm * Cout) * 2   # bf16 weights
                      + (C48 + Cm + Cout) * 4)                  # f32 shifts

    return pl.pallas_call(
        _fused_decoder_kernel,
        out_shape=jax.ShapeDtypeStruct((P, Cout), jnp.bfloat16),
        grid=grid,
        in_specs=[
            pl.BlockSpec((tm, Cm), lambda i: (i, 0)),      # xt pre-act tile
            pl.BlockSpec((tm, C2), lambda i: (i, 0)),      # xl tile
            pl.BlockSpec(w2s.shape, lambda i: (0, 0)),     # resident weights
            pl.BlockSpec(b2.shape, lambda i: (0, 0)),
            pl.BlockSpec(w3l.shape, lambda i: (0, 0)),
            pl.BlockSpec(b3a.shape, lambda i: (0, 0)),
            pl.BlockSpec(w3b.shape, lambda i: (0, 0)),
            pl.BlockSpec(b3b.shape, lambda i: (0, 0)),
        ],
        out_specs=pl.BlockSpec((tm, Cout), lambda i: (i, 0)),
        compiler_params=pltpu.CompilerParams(
            dimension_semantics=("parallel",)),
        cost_estimate=pl.CostEstimate(flops=flops, transcendentals=0,
                                      bytes_accessed=bytes_accessed),
    )(g_up, xl_flat, w2s, b2, w3l, b3a, w3b, b3b)


# ----------------------------------------------------------------------------
# Bilinear upsample (align_corners=True) as dense interpolation matrices so it
# runs on the MXU instead of gather hardware.
# TODO(synk): fold the row/col interp matmuls into the Pallas kernel (keep the
# low-res pre-activation VMEM-resident) if this XLA bf16 upsample ever shows
# up as the hot path.
# ----------------------------------------------------------------------------
def _interp_matrix(out_size, in_size):
    if out_size == 1:
        return jnp.zeros((1, in_size), jnp.float32).at[0, 0].set(1.0)
    pos = jnp.arange(out_size, dtype=jnp.float32) * (in_size - 1) / (out_size - 1)
    lo = jnp.clip(jnp.floor(pos).astype(jnp.int32), 0, in_size - 1)
    hi = jnp.minimum(lo + 1, in_size - 1)
    frac = pos - lo.astype(jnp.float32)
    rows = jnp.arange(out_size)
    m = jnp.zeros((out_size, in_size), jnp.float32)
    m = m.at[rows, lo].add(1.0 - frac)
    m = m.at[rows, hi].add(frac)
    return m


# ----------------------------------------------------------------------------
# Parameters (deterministic, synthetic).  Eval-mode BN:
#   y = gamma * (x - mean) / sqrt(var + eps) + beta == x * scale + shift
# ----------------------------------------------------------------------------
def make_params(key, inplane2=32, outplane=128, eps=1e-5):
    def bn(k, c):
        kg, kb, km, kv = jax.random.split(k, 4)
        gamma = jax.random.uniform(kg, (c,), jnp.float32, 0.5, 1.5)
        beta = jax.random.normal(kb, (c,), jnp.float32) * 0.1
        mean = jax.random.normal(km, (c,), jnp.float32) * 0.1
        var = jax.random.uniform(kv, (c,), jnp.float32, 0.5, 1.5)
        scale = gamma / jnp.sqrt(var + eps)
        shift = beta - mean * scale
        return scale, shift

    ks = jax.random.split(key, 6)
    p = {}
    p["w2"] = jax.random.normal(ks[0], (inplane2, 48), jnp.float32) * 0.05
    p["s2"], p["b2"] = bn(ks[1], 48)
    p["w3a"] = jax.random.normal(ks[2], (304, outplane), jnp.float32) * 0.05
    p["s3a"], p["b3a"] = bn(ks[3], outplane)
    p["w3b"] = jax.random.normal(ks[4], (outplane, outplane), jnp.float32) * 0.05
    p["s3b"], p["b3b"] = bn(ks[5], outplane)
    return p


# ----------------------------------------------------------------------------
# Forward pass (NCHW in / NCHW out to match the PyTorch module; output is
# bf16 — cast at the consumer if f32 is required).
# TODO(synk): the boundary NCHW<->NHWC transposes remain XLA ops; drop them if
# the surrounding network can stay channels-last.
# ----------------------------------------------------------------------------
def decoder_forward(xt_nchw, xl_nchw, params):
    N, Ct, Ht, Wt = xt_nchw.shape
    _, C2, H, W = xl_nchw.shape
    Cm = params["w3a"].shape[1]
    assert Ct + 48 == params["w3a"].shape[0], "xt channels must be 256"

    # Fold eval-mode BN scale into the conv weights (tiny, one-time under jit).
    w2s = (params["w2"] * params["s2"][None, :]).astype(jnp.bfloat16)
    w3a_s = params["w3a"] * params["s3a"][None, :]
    w3t = w3a_s[:Ct].astype(jnp.bfloat16)      # xt half of conv3a
    w3l = w3a_s[Ct:].astype(jnp.bfloat16)      # xl half of conv3a
    w3b_s = (params["w3b"] * params["s3b"][None, :]).astype(jnp.bfloat16)

    # --- Commute bilinear upsample with the linear conv3a xt-branch:
    # apply the 256->128 matmul at LOW resolution, then upsample the 128-ch
    # pre-activation (must happen before the xl branch / bias / ReLU).
    xt_low = jnp.transpose(xt_nchw, (0, 2, 3, 1)).astype(jnp.bfloat16)  # NHWC
    g_low = jnp.einsum("nhwc,cd->nhwd", xt_low, w3t,
                       preferred_element_type=jnp.float32)
    g_low = g_low.astype(jnp.bfloat16)                                  # (N,Ht,Wt,Cm)

    # Bilinear align_corners upsample as two dense interp matmuls, bf16
    # end-to-end so no full-resolution f32 intermediate ever hits HBM.
    Ih = _interp_matrix(H, Ht).astype(jnp.bfloat16)
    Iw = _interp_matrix(W, Wt).astype(jnp.bfloat16)
    g = jnp.einsum("oh,nhwd->nowd", Ih, g_low)     # upsample H  (N,H,Wt,Cm)
    g = jnp.einsum("pw,nowd->nopd", Iw, g)         # upsample W  (N,H,W,Cm)

    xl = jnp.transpose(xl_nchw, (0, 2, 3, 1)).astype(jnp.bfloat16)      # NHWC

    out = fused_decoder_convs(
        g.reshape(-1, Cm),
        xl.reshape(-1, C2),
        w2s,
        params["b2"].reshape(1, -1).astype(jnp.float32),
        w3l,
        params["b3a"].reshape(1, -1).astype(jnp.float32),
        w3b_s,
        params["b3b"].reshape(1, -1).astype(jnp.float32),
    )
    out = out.reshape(N, H, W, Cm)
    return jnp.transpose(out, (0, 3, 1, 2))        # (N, outplane, H, W) bf16


if __name__ == "__main__":
    # Small shapes consistent with the module: xt must have 256 channels
    # (304 = 256 + 48), xl uses a small inplane2, outplane = 128.
    N, XT_C, INPLANE2, OUTPLANE = 2, 256, 32, 128
    HT, WT, H, W = 8, 8, 16, 16

    key = jax.random.PRNGKey(0)
    k_xt, k_xl, k_p = jax.random.split(key, 3)
    xt = jax.random.normal(k_xt, (N, XT_C, HT, WT), jnp.float32)
    xl = jax.random.normal(k_xl, (N, INPLANE2, H, W), jnp.float32)
    params = make_params(k_p, inplane2=INPLANE2, outplane=OUTPLANE)

    fwd = jax.jit(decoder_forward)
    out = fwd(xt, xl, params)
    jax.block_until_ready(out)

    assert out.shape == (N, OUTPLANE, H, W), out.shape
    print("KERNEL_OK")
</pallas_src>

<mosaic_0001>
module attributes {stable_mosaic.version = 11 : i64} {
  func.func private @main(%arg0: i32) attributes {dimension_semantics = [#tpu.dimension_semantics<core_parallel>], iteration_bounds = array<i64: 2>, tpu.core_type = #tpu.core_type<sc_scalar_subcore>, window_params = []} {
    return
  }
}

module attributes {stable_mosaic.version = 11 : i64} {
  func.func private @main(%arg0: i32) attributes {dimension_semantics = [#tpu.dimension_semantics<core_parallel>], iteration_bounds = array<i64: 2>, tpu.core_type = #tpu.core_type<sc_scalar_subcore>, window_params = []} {
    return
  }
}

module attributes {stable_mosaic.version = 11 : i64} {
  func.func @_fused_decoder_kernel(%arg0: i32, %arg1: memref<256x128xbf16, #tpu.memory_space<vmem>>, %arg2: memref<256x32xbf16, #tpu.memory_space<vmem>>, %arg3: memref<32x48xbf16, #tpu.memory_space<vmem>>, %arg4: memref<1x48xf32, #tpu.memory_space<vmem>>, %arg5: memref<48x128xbf16, #tpu.memory_space<vmem>>, %arg6: memref<1x128xf32, #tpu.memory_space<vmem>>, %arg7: memref<128x128xbf16, #tpu.memory_space<vmem>>, %arg8: memref<1x128xf32, #tpu.memory_space<vmem>>, %arg9: memref<256x128xbf16, #tpu.memory_space<vmem>>) attributes {dimension_semantics = [#tpu.dimension_semantics<parallel>], iteration_bounds = array<i64: 2>, scalar_prefetch = 0 : i64, scratch_operands = 0 : i64, tpu.core_type = #tpu.core_type<tc>, window_params = [{transform_indices = @transform_0, window_bounds = array<i64: 256, 128>}, {transform_indices = @transform_1, window_bounds = array<i64: 256, 32>}, {pipeline_mode = #tpu.pipeline_mode<synchronous>, transform_indices = @transform_2, window_bounds = array<i64: 32, 48>}, {pipeline_mode = #tpu.pipeline_mode<synchronous>, transform_indices = @transform_3, window_bounds = array<i64: 1, 48>}, {pipeline_mode = #tpu.pipeline_mode<synchronous>, transform_indices = @transform_4, window_bounds = array<i64: 48, 128>}, {pipeline_mode = #tpu.pipeline_mode<synchronous>, transform_indices = @transform_5, window_bounds = array<i64: 1, 128>}, {pipeline_mode = #tpu.pipeline_mode<synchronous>, transform_indices = @transform_6, window_bounds = array<i64: 128, 128>}, {pipeline_mode = #tpu.pipeline_mode<synchronous>, transform_indices = @transform_7, window_bounds = array<i64: 1, 128>}, {transform_indices = @transform_8, window_bounds = array<i64: 256, 128>}]} {
    %c0 = arith.constant 0 : index
    %c0_0 = arith.constant 0 : index
    %0 = vector.load %arg2[%c0, %c0_0] : memref<256x32xbf16, #tpu.memory_space<vmem>>, vector<256x32xbf16>
    %c0_1 = arith.constant 0 : index
    %c0_2 = arith.constant 0 : index
    %1 = vector.load %arg3[%c0_1, %c0_2] : memref<32x48xbf16, #tpu.memory_space<vmem>>, vector<32x48xbf16>
    %cst = arith.constant dense<0.000000e+00> : vector<256x48xf32>
    %2 = tpu.matmul %0, %1, %cst {dimension_numbers = #tpu.dot_dimension_numbers<[1], [0], [0], [1], [0, 0, 1, 1], [], []>} : vector<256x32xbf16>, vector<32x48xbf16>, vector<256x48xf32> -> vector<256x48xf32>
    %c0_3 = arith.constant 0 : index
    %c0_4 = arith.constant 0 : index
    %3 = vector.load %arg4[%c0_3, %c0_4] : memref<1x48xf32, #tpu.memory_space<vmem>>, vector<1x48xf32>
    %4 = vector.broadcast %3 : vector<1x48xf32> to vector<256x48xf32>
    %5 = arith.addf %2, %4 : vector<256x48xf32>
    %cst_5 = arith.constant 0.000000e+00 : f32
    %6 = vector.broadcast %cst_5 : f32 to vector<256x48xf32>
    %7 = arith.maximumf %5, %6 : vector<256x48xf32>
    %c0_6 = arith.constant 0 : index
    %c0_7 = arith.constant 0 : index
    %8 = vector.load %arg1[%c0_6, %c0_7] : memref<256x128xbf16, #tpu.memory_space<vmem>>, vector<256x128xbf16>
    %9 = arith.extf %8 : vector<256x128xbf16> to vector<256x128xf32>
    %10 = arith.truncf %7 : vector<256x48xf32> to vector<256x48xbf16>
    %c0_8 = arith.constant 0 : index
    %c0_9 = arith.constant 0 : index
    %11 = vector.load %arg5[%c0_8, %c0_9] : memref<48x128xbf16, #tpu.memory_space<vmem>>, vector<48x128xbf16>
    %cst_10 = arith.constant dense<0.000000e+00> : vector<256x128xf32>
    %12 = tpu.matmul %10, %11, %cst_10 {dimension_numbers = #tpu.dot_dimension_numbers<[1], [0], [0], [1], [0, 0, 1, 1], [], []>} : vector<256x48xbf16>, vector<48x128xbf16>, vector<256x128xf32> -> vector<256x128xf32>
    %13 = arith.addf %9, %12 : vector<256x128xf32>
    %c0_11 = arith.constant 0 : index
    %c0_12 = arith.constant 0 : index
    %14 = vector.load %arg6[%c0_11, %c0_12] : memref<1x128xf32, #tpu.memory_space<vmem>>, vector<1x128xf32>
    %15 = vector.broadcast %14 : vector<1x128xf32> to vector<256x128xf32>
    %16 = arith.addf %13, %15 : vector<256x128xf32>
    %cst_13 = arith.constant 0.000000e+00 : f32
    %17 = vector.broadcast %cst_13 : f32 to vector<256x128xf32>
    %18 = arith.maximumf %16, %17 : vector<256x128xf32>
    %19 = arith.truncf %18 : vector<256x128xf32> to vector<256x128xbf16>
    %c0_14 = arith.constant 0 : index
    %c0_15 = arith.constant 0 : index
    %20 = vector.load %arg7[%c0_14, %c0_15] : memref<128x128xbf16, #tpu.memory_space<vmem>>, vector<128x128xbf16>
    %cst_16 = arith.constant dense<0.000000e+00> : vector<256x128xf32>
    %21 = tpu.matmul %19, %20, %cst_16 {dimension_numbers = #tpu.dot_dimension_numbers<[1], [0], [0], [1], [0, 0, 1, 1], [], []>} : vector<256x128xbf16>, vector<128x128xbf16>, vector<256x128xf32> -> vector<256x128xf32>
    %c0_17 = arith.constant 0 : index
    %c0_18 = arith.constant 0 : index
    %22 = vector.load %arg8[%c0_17, %c0_18] : memref<1x128xf32, #tpu.memory_space<vmem>>, vector<1x128xf32>
    %23 = vector.broadcast %22 : vector<1x128xf32> to vector<256x128xf32>
    %24 = arith.addf %21, %23 : vector<256x128xf32>
    %cst_19 = arith.constant 0.000000e+00 : f32
    %25 = vector.broadcast %cst_19 : f32 to vector<256x128xf32>
    %26 = arith.maximumf %24, %25 : vector<256x128xf32>
    %27 = arith.truncf %26 : vector<256x128xf32> to vector<256x128xbf16>
    %c0_20 = arith.constant 0 : index
    %c0_21 = arith.constant 0 : index
    %28 = vector.load %arg9[%c0_20, %c0_21] : memref<256x128xbf16, #tpu.memory_space<vmem>>, vector<256x128xbf16>
    tpu.vector_store %arg9[%c0_20, %c0_21], %27 {strides = array<i32>} : memref<256x128xbf16, #tpu.memory_space<vmem>>, vector<256x128xbf16>,
    return
  }
  func.func @transform_0(%arg0: i32) -> (i32, i32) {
    %c0_i32 = arith.constant 0 : i32
    %c0_i32_0 = arith.constant 0 : i32
    return %arg0, %c0_i32 : i32, i32
  }
  func.func @transform_1(%arg0: i32) -> (i32, i32) {
    %c0_i32 = arith.constant 0 : i32
    %c0_i32_0 = arith.constant 0 : i32
    return %arg0, %c0_i32 : i32, i32
  }
  func.func @transform_2(%arg0: i32) -> (i32, i32) {
    %c0_i32 = arith.constant 0 : i32
    %c0_i32_0 = arith.constant 0 : i32
    %c0_i32_1 = arith.constant 0 : i32
    return %c0_i32, %c0_i32_0 : i32, i32
  }
  func.func @transform_3(%arg0: i32) -> (i32, i32) {
    %c0_i32 = arith.constant 0 : i32
    %c0_i32_0 = arith.constant 0 : i32
    %c0_i32_1 = arith.constant 0 : i32
    return %c0_i32, %c0_i32_0 : i32, i32
  }
  func.func @transform_4(%arg0: i32) -> (i32, i32) {
    %c0_i32 = arith.constant 0 : i32
    %c0_i32_0 = arith.constant 0 : i32
    %c0_i32_1 = arith.constant 0 : i32
    return %c0_i32, %c0_i32_0 : i32, i32
  }
  func.func @transform_5(%arg0: i32) -> (i32, i32) {
    %c0_i32 = arith.constant 0 : i32
    %c0_i32_0 = arith.constant 0 : i32
    %c0_i32_1 = arith.constant 0 : i32
    return %c0_i32, %c0_i32_0 : i32, i32
  }
  func.func @transform_6(%arg0: i32) -> (i32, i32) {
    %c0_i32 = arith.constant 0 : i32
    %c0_i32_0 = arith.constant 0 : i32
    %c0_i32_1 = arith.constant 0 : i32
    return %c0_i32, %c0_i32_0 : i32, i32
  }
  func.func @transform_7(%arg0: i32) -> (i32, i32) {
    %c0_i32 = arith.constant 0 : i32
    %c0_i32_0 = arith.constant 0 : i32
    %c0_i32_1 = arith.constant 0 : i32
    return %c0_i32, %c0_i32_0 : i32, i32
  }
  func.func @transform_8(%arg0: i32) -> (i32, i32) {
    %c0_i32 = arith.constant 0 : i32
    %c0_i32_0 = arith.constant 0 : i32
    return %arg0, %c0_i32 : i32, i32
  }
}

</mosaic_0001>

<bundles_post_ra>
// kernel: decoder_forward.1
= control target key start
LH: loop header
LB: loop body
LE: loop exit
PB: predicated region body
PF: predicated region fallthrough
CT: control target
= control target key end

     0   :  { %13 = vsyncpa [#allocation3], 0  ;;  %s2697_s0 = inlined_call_operand.vmem [shape: bf16[512,128], index: 0, kind: input, shape index: {}]   ;;  %s2698_s1 = inlined_call_operand.vmem [shape: bf16[512,32], index: 1, kind: input, shape index: {}]   ;;  %s2699_s2 = inlined_call_operand.vmem [shape: bf16[32,48], index: 2, kind: input, shape index: {}]   ;;  %s2700_s3 = inlined_call_operand.vmem [shape: f32[1,48], index: 3, kind: input, shape index: {}]   ;;  %s2701_s4 = inlined_call_operand.vmem [shape: bf16[48,128], index: 4, kind: input, shape index: {}]   ;;  %s2702_s5 = inlined_call_operand.vmem [shape: f32[1,128], index: 5, kind: input, shape index: {}]   ;;  %s2703_s6 = inlined_call_operand.vmem [shape: bf16[128,128], index: 6, kind: input, shape index: {}]   ;;  %s2704_s7 = inlined_call_operand.vmem [shape: f32[1,128], index: 7, kind: input, shape index: {}]   ;;  %s2705_s8 = inlined_call_operand.hbm [shape: bf16[512,128], index: 8, kind: output, shape index: {}]  }
   0x1   :  { %15 = vsyncpa [#allocation3 + $0x1], 0  ;;  %s2338_s27 = smov 0   ;;  %s2340_s28 = smov 0  }
   0x2   :  { %s2342_s29 = smov 0   ;;  %s2344_s30 = smov 0  }
   0x3 LB: > { %s2359_s9 = sadd.s32 4294967295, %s2288_s30   ;;  %s1652_s10 = sadd.s32 4294967294, %s2288_s30   ;;  %s2288_s30 = sphi %s2344_s30, %s2711_s30   ;;  %s2284_s29 = sphi %s2342_s29, %s2710_s29   ;;  %s2280_s28 = sphi %s2340_s28, %s2709_s28   ;;  %s2276_s27 = sphi %s2338_s27, %s2708_s27  }
   0x4   : > { %s2363_s11 = sadd.s32 1, %s2288_s30   ;;  %s206_s12 = sadd.s32 1, %s2284_s29 }
   0x5   : > { %s203_s13 = ssub.s32 %s2288_s30, %s2363_s11  ;;  %p216_p0 = scmp.ne.s32.totalorder %s2284_s29, %s2280_s28 }
   0x6   : > { %p204_p1 = scmp.eq.s32.totalorder %s203_s13, 0  ;;  %p217_p2 = scmp.eq.s32.totalorder %s2359_s9, 1 }
   0x7   : > { %p222_p3 = scmp.ne.s32.totalorder %s2280_s28, %s2276_s27  ;;  %p223_p4 = scmp.eq.s32.totalorder %s1652_s10, 1 }
   0x8   : > { %s2374_s14 = scalar_select %p204_p1, %s2284_s29, %s206_s12  }
   0x9   : > { %p2376_p5 = por %p217_p2, %p216_p0  ;;  %p2380_p6 = por %p223_p4, %p222_p3 }
   0xa   : > { %p1655_p7 = scmp.ge.s32.totalorder %s2288_s30, 1  ;;  %p277_p8 = scmp.lt.s32.totalorder %s2288_s30, 3 }
   0xc   : > { %p278_p9 = pnand %p1655_p7, %p277_p8 }
   0xd   : > { %v2197_v0 = vld [vmem:[%s2699_s2] sm:$0xff] (!%p278_p9)   ;;  %s1657_s19 = sshll.u32 (!%p278_p9), %s2359_s9, 5  ;;  %v2198_v1 = vld [vmem:[%s2699_s2 + $0x8] sm:$0xff] (!%p278_p9)   ;;  %vm465_vm0 = vcmask (!%p278_p9), 261120   ;;  %v2217_v20 = vld [vmem:[%s2701_s4 + $0x10] sm:$0xff] (!%p278_p9)   ;;  %vm811_vm1 = vcmask (!%p278_p9), 392192  }
   0xe   : > { %281 = sbr.rel (%p278_p9) target bundleno = 764 (0x2fc), region = 52  ;;  %p317_p10 = scmp.lt.s32.totalorder (!%p278_p9), %s1657_s19, 63  ;;  %2030 = vmatprep.subr.bf16.mxu0 (!%p278_p9), %v2197_v0  ;;  %2152 = vmatprep.subr.bf16.mxu1 (!%p278_p9), %v2197_v0  ;;  %v2215_v2 = vld [vmem:[%s2701_s4] sm:$0xff] (!%p278_p9)   ;;  %v2216_v9 = vld [vmem:[%s2701_s4 + $0x8] sm:$0xff] (!%p278_p9)   ;;  %v2220_v23 = vld [vmem:[%s2703_s6 + $0x10] sm:$0xff] (!%p278_p9)  }
   0xf   : > { %2031 = vmatpush3.bf16.msra.mxu0 (!%p278_p9), %v2197_v0  ;;  %2154 = vmatpush3.bf16.msra.mxu1 (!%p278_p9), %v2197_v0  ;;  %v2218_v21 = vld [vmem:[%s2703_s6] sm:$0xff] (!%p278_p9)   ;;  %v2219_v22 = vld [vmem:[%s2703_s6 + $0x8] sm:$0xff] (!%p278_p9)   ;;  %v2221_v24 = vld [vmem:[%s2703_s6 + $0x18] sm:$0xff] (!%p278_p9)   ;;  %s313_s21 = sand.u32 (!%p278_p9), 1, %s2280_s28   ;;  %s1794_s25 = sshll.u32 (!%p278_p9), %s2359_s9, 11 }
  0x10   : > { %2032 = vmatprep.subr.bf16.mxu0 (!%p278_p9), %v2198_v1  ;;  %2153 = vmatprep.subr.bf16.mxu1 (!%p278_p9), %v2198_v1  ;;  %v2222_v25 = vld [vmem:[%s2703_s6 + $0x20] sm:$0xff] (!%p278_p9)   ;;  %s1656_s22 = sshll.u32 (!%p278_p9), %s313_s21, 7  ;;  %s2648_s13 = scalar_lea.hbm (!%p278_p9), %s2705_s8, %s1794_s25 }
  0x11   : > { %v2462_v26 = vld [vmem:[%s2700_s3] ss:$0 sm:$0xff] (!%p278_p9)  ;;  %s2599_s23 = scalar_lea.vmem (!%p278_p9), [#allocation2], %s1656_s22  ;;  %s2656_s9 = scalar_lea.sflag (!%p278_p9), [#allocation3], %s313_s21 }
  0x12   : > { %s1578_s26 = sshll.u32 (!%p278_p9), %s2599_s23, 4  ;;  %s2290_s18 = smov (!%p278_p9), [#allocation2]   ;;  %s2650_s26 = int_to_ptr.vmem [resolvable:$true] %s1578_s26 }
  0x13   : > { %2033 = vmatpush3.bf16.msra.mxu0 (!%p278_p9), %v2198_v1  ;;  %2155 = vmatpush3.bf16.msra.mxu1 (!%p278_p9), %v2198_v1  ;;  %s2230_s20 = sshll.u32 (!%p278_p9), %s2290_s18, 4  ;;  %s2231_s20 = int_to_ptr.vmem [resolvable:$false] %s2230_s20 }
  0x14   : > { %2066 = vmatprep.subr.bf16.mxu1 (!%p278_p9), %v2215_v2  ;;  %2104 = vmatprep.subr.bf16.mxu0 (!%p278_p9), %v2218_v21  ;;  %p2233_p0 = scmp.lt.s32.totalorder (!%p278_p9), %s2650_s26, %s2231_s20 }
  0x15   : > { %s2713_s19 = smov (!%p317_p10, %s1657_s19), 63 }
  0x16   : > { %s1658_s24 = sshll.u32 %s2713_s19, 2  ;;  %s2232_s19 = scalar_lea.vmem %s2231_s20, 4096 }
  0x17   : > { %s2404_s10 = scalar_lea.vmem %s2698_s1, %s1658_s24  ;;  %s2532_s17 = scalar_lea.vmem %s2697_s0, %s1658_s24 }
  0x18   : > { %v2199_v3 = vld [vmem:[%s2404_s10] sm:$0xff]   ;;  %v2200_v4 = vld [vmem:[%s2404_s10 + $0x8] sm:$0xff]   ;;  %v2201_v5 = vld [vmem:[%s2404_s10 + $0x10] sm:$0xff]  }
  0x19   : > { %2034 = vmatprep.mubr.msk.bf16.mxu0 %vm465_vm0, %v2199_v3  ;;  %v2202_v6 = vld [vmem:[%s2404_s10 + $0x18] sm:$0xff]   ;;  %v2203_v7 = vld [vmem:[%s2404_s10 + $0x20] sm:$0xff]   ;;  %v2208_v10 = vld [vmem:[%s2404_s10 + $0x48] sm:$0xff]  }
  0x1a   : > { %2035 = vmatmul.mubr.msk.bf16.vlgmr.msra.gmra.mrb[0].mxu0 %vm465_vm0, %v2200_v4  ;;  %v2207_v8 = vld [vmem:[%s2404_s10 + $0x40] sm:$0xff]   ;;  %v2209_v11 = vld [vmem:[%s2404_s10 + $0x50] sm:$0xff]   ;;  %v2204_v12 = vld [vmem:[%s2404_s10 + $0x28] sm:$0xff]  }
  0x1b   : > { %2038 = vmatprep.mubr.msk.bf16.mxu0 %vm465_vm0, %v2201_v5  ;;  %2050 = vmatprep.mubr.msk.bf16.mxu1 %vm465_vm0, %v2207_v8  ;;  %v2205_v13 = vld [vmem:[%s2404_s10 + $0x30] sm:$0xff]   ;;  %v2210_v14 = vld [vmem:[%s2404_s10 + $0x58] sm:$0xff]   ;;  %v2211_v15 = vld [vmem:[%s2404_s10 + $0x60] sm:$0xff]  }
  0x1c   : > { %2051 = vmatmul.mubr.msk.bf16.vlgmr.msra.gmra.mrb[0].mxu1 %vm465_vm0, %v2208_v10  ;;  %v2206_v16 = vld [vmem:[%s2404_s10 + $0x38] sm:$0xff]   ;;  %v2212_v17 = vld [vmem:[%s2404_s10 + $0x68] sm:$0xff]   ;;  %v2213_v18 = vld [vmem:[%s2404_s10 + $0x70] sm:$0xff]   ;;  %2105 = vmatpush3.bf16.msra.mxu0 %v2218_v21 }
  0x1d   : > { %2054 = vmatprep.mubr.msk.bf16.mxu1 %vm465_vm0, %v2209_v11  ;;  %2067 = vmatpush3.bf16.msra.mxu1 %v2215_v2  ;;  %v2214_v19 = vld [vmem:[%s2404_s10 + $0x78] sm:$0xff]  }
  0x1e   : > { %2068 = vmatprep.subr.bf16.mxu1 %v2216_v9  ;;  %2106 = vmatprep.subr.bf16.mxu0 %v2219_v22 }
  0x20   : > { %2107 = vmatpush3.bf16.msra.mxu0 %v2219_v22 }
  0x21   : > { %2069 = vmatpush3.bf16.msra.mxu1 %v2216_v9  ;;  %2108 = vmatprep.subr.bf16.mxu0 %v2220_v23 }
  0x22   : > { %2039 = vmatmul.mubr.msk.bf16.gmra.mrb[4].mxu0 %vm465_vm0, %v2202_v6  ;;  %2070 = vmatprep.subr.bf16.mxu1 %v2217_v20 }
  0x23   : > { %2042 = vmatprep.mubr.msk.bf16.mxu0 %vm465_vm0, %v2203_v7 }
  0x24   : > { %2055 = vmatmul.mubr.msk.bf16.gmra.mrb[4].mxu1 %vm465_vm0, %v2210_v14  ;;  %2109 = vmatpush3.bf16.msra.mxu0 %v2220_v23 }
  0x25   : > { %2058 = vmatprep.mubr.msk.bf16.mxu1 %vm465_vm0, %v2211_v15  ;;  %2071 = vmatpush3.bf16.msra.mxu1 %v2217_v20 }
  0x26   : > { %2110 = vmatprep.subr.bf16.mxu0 %v2221_v24 }
  0x28   : > { %2111 = vmatpush3.bf16.msra.mxu0 %v2221_v24 }
  0x29   : > { %2112 = vmatprep.subr.bf16.mxu0 %v2222_v25 }
  0x2a   : > { %2043 = vmatmul.mubr.msk.bf16.gmra.mrb[8].mxu0 %vm465_vm0, %v2204_v12 }
  0x2b   : > { %2046 = vmatprep.mubr.msk.bf16.mxu0 %vm465_vm0, %v2205_v13 }
  0x2c   : > { %2059 = vmatmul.mubr.msk.bf16.gmra.mrb[8].mxu1 %vm465_vm0, %v2212_v17  ;;  %2113 = vmatpush3.bf16.msra.mxu0 %v2222_v25 }
  0x2d   : > { %2062 = vmatprep.mubr.msk.bf16.mxu1 %vm465_vm0, %v2213_v18 }
  0x32   : > { %2047 = vmatmul.mubr.msk.bf16.gmra.mrb[12].mxu0 %vm465_vm0, %v2206_v16 }
  0x34   : > { %2063 = vmatmul.mubr.msk.bf16.gmra.mrb[12].mxu1 %vm465_vm0, %v2214_v19 }
  0xed   : > { %v2036_v27 = vpop.f32.mrb[0].mxu0 }
  0xee   : > { %v557_v28 = vadd.f32 %v2036_v27, %v2462_v26  ;;  %v548_v29 = vpop.f32.mrb[1].mxu0 }
  0xef   : > { %v549_v30 = vadd.f32 %v2462_v26, %v548_v29  ;;  %v2037_v31 = vpop.f32.mrb[2].mxu0  ;;  %v2052_v42 = vpop.f32.mrb[0].mxu1 }
  0xf0   : > { %v560_v32 = vadd.f32 %v2037_v31, %v2462_v26  ;;  %v551_v33 = vpop.f32.mrb[3].mxu0  ;;  %v677_v35 = vmax.f32 %v557_v28, 0.0  ;;  %v621_v45 = vadd.f32 %v2052_v42, %v2462_v26  ;;  %v612_v46 = vpop.f32.mrb[1].mxu1 }
  0xf1   : > { %v552_v34 = vadd.f32 %v2462_v26, %v551_v33  ;;  %v675_v37 = vmax.f32 %v549_v30, 0.0  ;;  %v613_v49 = vadd.f32 %v2462_v26, %v612_v46  ;;  %v2053_v50 = vpop.f32.mrb[2].mxu1 }
  0xf2   : > { %v678_v36 = vmax.f32 %v560_v32, 0.0  ;;  %v693_v53 = vmax.f32 %v621_v45, 0.0  ;;  %v624_v54 = vadd.f32 %v2053_v50, %v2462_v26  ;;  %v615_v55 = vpop.f32.mrb[3].mxu1 }
  0xf3   : > { %v676_v38 = vmax.f32 %v552_v34, 0.0  ;;  %v691_v57 = vmax.f32 %v613_v49, 0.0  ;;  %v616_v58 = vadd.f32 %v2462_v26, %v615_v55 }
  0xf4   : > { %v772_v39 = vpack.c.bf16 %v678_v36, %v677_v35  ;;  %v694_v61 = vmax.f32 %v624_v54, 0.0 }
  0xf5   : > { %v771_v40 = vpack.c.bf16 %v676_v38, %v675_v37  ;;  %v2040_v41 = vpop.f32.mrb[4].mxu0  ;;  %v692_v0 = vmax.f32 %v616_v58, 0.0 }
  0xf6   : > { %v573_v43 = vadd.f32 %v2040_v41, %v2462_v26  ;;  %v564_v44 = vpop.f32.mrb[5].mxu0  ;;  %v2478_v2 = vpack.c.bf16 %v694_v61, %v693_v53 }
  0xf7   : > { %v565_v47 = vadd.f32 %v2462_v26, %v564_v44  ;;  %v2041_v48 = vpop.f32.mrb[6].mxu0  ;;  %2072 = vmatprep.mubr.msk.bf16.mxu1 %vm811_vm1, %v771_v40  ;;  %v2480_v5 = vpack.c.bf16 %v692_v0, %v691_v57  ;;  %v2056_v6 = vpop.f32.mrb[4].mxu1 }
  0xf8   : > { %v576_v51 = vadd.f32 %v2041_v48, %v2462_v26  ;;  %v567_v52 = vpop.f32.mrb[7].mxu0  ;;  %2073 = vmatmul.mubr.msk.bf16.vlgmr.msra.gmra.mrb[16].mxu1 %vm811_vm1, %v772_v39  ;;  %v681_v59 = vmax.f32 %v573_v43, 0.0  ;;  %v637_v9 = vadd.f32 %v2056_v6, %v2462_v26  ;;  %v628_v10 = vpop.f32.mrb[5].mxu1 }
  0xf9   : > { %v568_v56 = vadd.f32 %v2462_v26, %v567_v52  ;;  %v679_v62 = vmax.f32 %v565_v47, 0.0  ;;  %v629_v13 = vadd.f32 %v2462_v26, %v628_v10  ;;  %v2057_v14 = vpop.f32.mrb[6].mxu1 }
  0xfa   : > { %v682_v60 = vmax.f32 %v576_v51, 0.0  ;;  %v697_v17 = vmax.f32 %v637_v9, 0.0  ;;  %v640_v18 = vadd.f32 %v2057_v14, %v2462_v26  ;;  %v631_v19 = vpop.f32.mrb[7].mxu1  ;;  %v1939_v14 = vld [vmem:[%s2532_s17 + $0x8] sm:$0xff]  }
  0xfb   : > { %v680_v63 = vmax.f32 %v568_v56, 0.0  ;;  %v695_v21 = vmax.f32 %v629_v13, 0.0  ;;  %v632_v22 = vadd.f32 %v2462_v26, %v631_v19 }
  0xfc   : > { %v774_v1 = vpack.c.bf16 %v682_v60, %v681_v59  ;;  %v698_v25 = vmax.f32 %v640_v18, 0.0  ;;  %v1802_v18 = vunpack.c.h.bf16 %v1939_v14 }
  0xfd   : > { %v773_v3 = vpack.c.bf16 %v680_v63, %v679_v62  ;;  %v2044_v4 = vpop.f32.mrb[8].mxu0  ;;  %v696_v29 = vmax.f32 %v632_v22, 0.0 }
  0xfe   : > { %v589_v7 = vadd.f32 %v2044_v4, %v2462_v26  ;;  %v580_v8 = vpop.f32.mrb[9].mxu0  ;;  %v782_v31 = vpack.c.bf16 %v698_v25, %v697_v17 }
  0xff   : > { %v581_v11 = vadd.f32 %v2462_v26, %v580_v8  ;;  %v2045_v12 = vpop.f32.mrb[10].mxu0  ;;  %2076 = vmatprep.mubr.msk.bf16.mxu1 %vm811_vm1, %v773_v3  ;;  %v781_v34 = vpack.c.bf16 %v696_v29, %v695_v21  ;;  %v2060_v35 = vpop.f32.mrb[8].mxu1 }
 0x100   : > { %v592_v15 = vadd.f32 %v2045_v12, %v2462_v26  ;;  %v583_v16 = vpop.f32.mrb[11].mxu0  ;;  %2077 = vmatmul.mubr.msk.bf16.gmra.mrb[20].mxu1 %vm811_vm1, %v774_v1  ;;  %v685_v23 = vmax.f32 %v589_v7, 0.0  ;;  %v653_v38 = vadd.f32 %v2060_v35, %v2462_v26  ;;  %v644_v39 = vpop.f32.mrb[9].mxu1 }
 0x101   : > { %v584_v20 = vadd.f32 %v2462_v26, %v583_v16  ;;  %v683_v27 = vmax.f32 %v581_v11, 0.0  ;;  %v645_v42 = vadd.f32 %v2462_v26, %v644_v39  ;;  %v2061_v43 = vpop.f32.mrb[10].mxu1  ;;  %v1801_v16 = vunpack.c.l.bf16 %v1939_v14  ;;  %v1944_v14 = vld [vmem:[%s2532_s17 + $0x30] sm:$0xff]  }
 0x102   : > { %v686_v24 = vmax.f32 %v592_v15, 0.0  ;;  %v701_v46 = vmax.f32 %v653_v38, 0.0  ;;  %v656_v47 = vadd.f32 %v2061_v43, %v2462_v26  ;;  %v647_v48 = vpop.f32.mrb[11].mxu1  ;;  %v1796_v15 = vld [vmem:[%s2532_s17] sm:$0xff]  }
 0x103   : > { %v684_v28 = vmax.f32 %v584_v20, 0.0  ;;  %v699_v50 = vmax.f32 %v645_v42, 0.0  ;;  %v648_v51 = vadd.f32 %v2462_v26, %v647_v48  ;;  %v1797_v17 = vunpack.c.l.bf16 %v1796_v15  ;;  %v2539_v20 = vld [vmem:[%s2702_s5] ss:$0 sm:$0xff] }
 0x104   : > { %v776_v30 = vpack.c.bf16 %v686_v24, %v685_v23  ;;  %v702_v54 = vmax.f32 %v656_v47, 0.0  ;;  %v1798_v21 = vunpack.c.h.bf16 %v1796_v15 }
 0x105   : > { %v775_v32 = vpack.c.bf16 %v684_v28, %v683_v27  ;;  %v2048_v33 = vpop.f32.mrb[12].mxu0  ;;  %v700_v57 = vmax.f32 %v648_v51, 0.0  ;;  %v1941_v27 = vld [vmem:[%s2532_s17 + $0x18] sm:$0xff]   ;;  %v1943_v51 = vld [vmem:[%s2532_s17 + $0x28] sm:$0xff]  }
 0x106   : > { %v605_v36 = vadd.f32 %v2048_v33, %v2462_v26  ;;  %v596_v37 = vpop.f32.mrb[13].mxu0  ;;  %v784_v59 = vpack.c.bf16 %v702_v54, %v701_v46  ;;  %v1809_v35 = vunpack.c.l.bf16 %v1941_v27 }
 0x107   : > { %v597_v40 = vadd.f32 %v2462_v26, %v596_v37  ;;  %v2049_v41 = vpop.f32.mrb[14].mxu0  ;;  %2080 = vmatprep.mubr.msk.bf16.mxu1 %vm811_vm1, %v775_v32  ;;  %v783_v61 = vpack.c.bf16 %v700_v57, %v699_v50  ;;  %v2064_v62 = vpop.f32.mrb[12].mxu1 }
 0x108   : > { %v608_v44 = vadd.f32 %v2049_v41, %v2462_v26  ;;  %v599_v45 = vpop.f32.mrb[15].mxu0  ;;  %2081 = vmatmul.mubr.msk.bf16.gmra.mrb[24].mxu1 %vm811_vm1, %v776_v30  ;;  %v689_v52 = vmax.f32 %v605_v36, 0.0  ;;  %v669_v63 = vadd.f32 %v2064_v62, %v2462_v26  ;;  %v660_v0 = vpop.f32.mrb[13].mxu1 }
 0x109   : > { %v600_v49 = vadd.f32 %v2462_v26, %v599_v45  ;;  %v687_v55 = vmax.f32 %v597_v40, 0.0  ;;  %v661_v1 = vadd.f32 %v2462_v26, %v660_v0  ;;  %v2065_v3 = vpop.f32.mrb[14].mxu1  ;;  %v1810_v40 = vunpack.c.h.bf16 %v1941_v27 }
 0x10a   : > { %v690_v53 = vmax.f32 %v608_v44, 0.0  ;;  %v705_v4 = vmax.f32 %v669_v63, 0.0  ;;  %v672_v6 = vadd.f32 %v2065_v3, %v2462_v26  ;;  %v663_v7 = vpop.f32.mrb[15].mxu1  ;;  %v1818_v0 = vunpack.c.h.bf16 %v1943_v51 }
 0x10b   : > { %v688_v56 = vmax.f32 %v600_v49, 0.0  ;;  %v703_v8 = vmax.f32 %v661_v1, 0.0  ;;  %v664_v9 = vadd.f32 %v2462_v26, %v663_v7  ;;  %v2223_v26 = vld [vmem:[%s2703_s6 + $0x28] sm:$0xff]  }
 0x10c   : > { %v778_v58 = vpack.c.bf16 %v690_v53, %v689_v52  ;;  %v706_v10 = vmax.f32 %v672_v6, 0.0  ;;  %2114 = vmatprep.subr.bf16.mxu0 %v2223_v26 }
 0x10d   : > { %v777_v60 = vpack.c.bf16 %v688_v56, %v687_v55  ;;  %v704_v11 = vmax.f32 %v664_v9, 0.0  ;;  %2115 = vmatpush3.bf16.msra.mxu0 %v2223_v26  ;;  %v1942_v55 = vld [vmem:[%s2532_s17 + $0x20] sm:$0xff]  }
 0x10e   : > { %v786_v12 = vpack.c.bf16 %v706_v10, %v705_v4  ;;  %v1814_v6 = vunpack.c.h.bf16 %v1942_v55 }
 0x10f   : > { %2084 = vmatprep.mubr.msk.bf16.mxu1 %vm811_vm1, %v777_v60  ;;  %v785_v13 = vpack.c.bf16 %v704_v11, %v703_v8 }
 0x110   : > { %2085 = vmatmul.mubr.msk.bf16.gmra.mrb[28].mxu1 %vm811_vm1, %v778_v58 }
 0x111   : > { %2088 = vmatprep.mubr.msk.bf16.mxu1 %vm811_vm1, %v2480_v5  ;;  %v2225_v5 = vld [vmem:[%s2703_s6 + $0x38] sm:$0xff]  }
 0x118   : > { %2089 = vmatmul.mubr.msk.bf16.gmra.mrb[32].mxu1 %vm811_vm1, %v2478_v2  ;;  %v2224_v2 = vld [vmem:[%s2703_s6 + $0x30] sm:$0xff]  }
 0x119   : > { %2092 = vmatprep.mubr.msk.bf16.mxu1 %vm811_vm1, %v781_v34  ;;  %2116 = vmatprep.subr.bf16.mxu0 %v2224_v2 }
 0x11a   : > { %2117 = vmatpush3.bf16.msra.mxu0 %v2224_v2 }
 0x11b   : > { %2118 = vmatprep.subr.bf16.mxu0 %v2225_v5 }
 0x11e   : > { %2119 = vmatpush3.bf16.msra.mxu0 %v2225_v5 }
 0x120   : > { %2093 = vmatmul.mubr.msk.bf16.gmra.mrb[36].mxu1 %vm811_vm1, %v782_v31  ;;  %v1940_v31 = vld [vmem:[%s2532_s17 + $0x10] sm:$0xff]  }
 0x121   : > { %2096 = vmatprep.mubr.msk.bf16.mxu1 %vm811_vm1, %v783_v61  ;;  %v1805_v37 = vunpack.c.l.bf16 %v1940_v31  ;;  %v1806_v44 = vunpack.c.h.bf16 %v1940_v31  ;;  %v1813_v61 = vunpack.c.l.bf16 %v1942_v55 }
 0x128   : > { %2097 = vmatmul.mubr.msk.bf16.gmra.mrb[40].mxu1 %vm811_vm1, %v784_v59  ;;  %v1817_v59 = vunpack.c.l.bf16 %v1943_v51 }
 0x129   : > { %2100 = vmatprep.mubr.msk.bf16.mxu1 %vm811_vm1, %v785_v13  ;;  %v1945_v13 = vld [vmem:[%s2532_s17 + $0x38] sm:$0xff]  }
 0x130   : > { %2101 = vmatmul.mubr.msk.bf16.gmra.mrb[44].mxu1 %vm811_vm1, %v786_v12 }
 0x1cb   : > { %v2074_v19 = vpop.f32.mrb[16].mxu1 }
 0x1cc   : > { %v1023_v22 = vadd.f32 %v2074_v19, %v1801_v16  ;;  %v894_v23 = vpop.f32.mrb[17].mxu1 }
 0x1cd   : > { %v1021_v24 = vadd.f32 %v1797_v17, %v894_v23  ;;  %v2075_v25 = vpop.f32.mrb[18].mxu1 }
 0x1ce   : > { %v1062_v28 = vadd.f32 %v2539_v20, %v1023_v22  ;;  %v1024_v29 = vadd.f32 %v2075_v25, %v1802_v18  ;;  %v897_v30 = vpop.f32.mrb[19].mxu1  ;;  %v1825_v18 = vunpack.c.l.bf16 %v1945_v13 }
 0x1cf   : > { %v1060_v32 = vadd.f32 %v2539_v20, %v1021_v24  ;;  %v1022_v33 = vadd.f32 %v1798_v21, %v897_v30  ;;  %v1821_v21 = vunpack.c.l.bf16 %v1944_v14  ;;  %v1826_v24 = vunpack.c.h.bf16 %v1945_v13 }
 0x1d0   : > { %v1063_v34 = vadd.f32 %v2539_v20, %v1024_v29  ;;  %v1094_v38 = vmax.f32 %v1062_v28, 0.0  ;;  %v1822_v29 = vunpack.c.h.bf16 %v1944_v14 }
 0x1d1   : > { %v1061_v36 = vadd.f32 %v2539_v20, %v1022_v33  ;;  %v1092_v41 = vmax.f32 %v1060_v32, 0.0 }
 0x1d2   : > { %v1095_v39 = vmax.f32 %v1063_v34, 0.0 }
 0x1d3   : > { %v1093_v42 = vmax.f32 %v1061_v36, 0.0  ;;  %v2078_v43 = vpop.f32.mrb[20].mxu1  ;;  %v1947_v36 = vld [vmem:[%s2532_s17 + $0x48] sm:$0xff]  }
 0x1d4   : > { %v1125_v45 = vpack.c.bf16 %v1095_v39, %v1094_v38  ;;  %v1027_v46 = vadd.f32 %v2078_v43, %v1809_v35  ;;  %v910_v47 = vpop.f32.mrb[21].mxu1 }
 0x1d5   : > { %v1025_v48 = vadd.f32 %v1805_v37, %v910_v47  ;;  %v2079_v49 = vpop.f32.mrb[22].mxu1  ;;  %v1124_v50 = vpack.c.bf16 %v1093_v42, %v1092_v41 }
 0x1d6   : > { %v1066_v52 = vadd.f32 %v2539_v20, %v1027_v46  ;;  %v1028_v53 = vadd.f32 %v2079_v49, %v1810_v40  ;;  %v913_v54 = vpop.f32.mrb[23].mxu1  ;;  %v1946_v40 = vld [vmem:[%s2532_s17 + $0x40] sm:$0xff]   ;;  %v1834_v49 = vunpack.c.h.bf16 %v1947_v36 }
 0x1d7   : > { %v1064_v56 = vadd.f32 %v2539_v20, %v1025_v48  ;;  %v1026_v57 = vadd.f32 %v1806_v44, %v913_v54  ;;  %2120 = vmatprep.mubr.bf16.mxu0 %v1124_v50  ;;  %v1833_v44 = vunpack.c.l.bf16 %v1947_v36  ;;  %v1829_v46 = vunpack.c.l.bf16 %v1946_v40 }
 0x1d8   : > { %v1067_v58 = vadd.f32 %v2539_v20, %v1028_v53  ;;  %2121 = vmatmul.mubr.bf16.vlgmr.msra.gmra.mrb[16].mxu0 %v1125_v45  ;;  %v1098_v62 = vmax.f32 %v1066_v52, 0.0  ;;  %v1830_v53 = vunpack.c.h.bf16 %v1946_v40 }
 0x1d9   : > { %v1065_v60 = vadd.f32 %v2539_v20, %v1026_v57  ;;  %v1096_v1 = vmax.f32 %v1064_v56, 0.0 }
 0x1da   : > { %v1099_v63 = vmax.f32 %v1067_v58, 0.0 }
 0x1db   : > { %v1097_v3 = vmax.f32 %v1065_v60, 0.0  ;;  %v2082_v4 = vpop.f32.mrb[24].mxu1  ;;  %v1949_v60 = vld [vmem:[%s2532_s17 + $0x58] sm:$0xff]  }
 0x1dc   : > { %v1031_v7 = vadd.f32 %v2082_v4, %v1817_v59  ;;  %v926_v8 = vpop.f32.mrb[25].mxu1  ;;  %v1127_v9 = vpack.c.bf16 %v1099_v63, %v1098_v62 }
 0x1dd   : > { %v1029_v10 = vadd.f32 %v1813_v61, %v926_v8  ;;  %v2083_v11 = vpop.f32.mrb[26].mxu1  ;;  %v1126_v12 = vpack.c.bf16 %v1097_v3, %v1096_v1 }
 0x1de   : > { %v1070_v26 = vadd.f32 %v2539_v20, %v1031_v7  ;;  %v1032_v2 = vadd.f32 %v2083_v11, %v1818_v0  ;;  %v929_v5 = vpop.f32.mrb[27].mxu1  ;;  %v1948_v0 = vld [vmem:[%s2532_s17 + $0x50] sm:$0xff]   ;;  %v1842_v11 = vunpack.c.h.bf16 %v1949_v60 }
 0x1df   : > { %v1068_v15 = vadd.f32 %v2539_v20, %v1029_v10  ;;  %v1030_v16 = vadd.f32 %v1814_v6, %v929_v5  ;;  %2124 = vmatprep.mubr.bf16.mxu0 %v1126_v12  ;;  %v1841_v6 = vunpack.c.l.bf16 %v1949_v60  ;;  %v1837_v8 = vunpack.c.l.bf16 %v1948_v0 }
 0x1e0   : > { %v1071_v17 = vadd.f32 %v2539_v20, %v1032_v2  ;;  %2125 = vmatmul.mubr.bf16.gmra.mrb[20].mxu0 %v1127_v9  ;;  %v1102_v22 = vmax.f32 %v1070_v26, 0.0  ;;  %v1838_v2 = vunpack.c.h.bf16 %v1948_v0 }
 0x1e1   : > { %v1069_v19 = vadd.f32 %v2539_v20, %v1030_v16  ;;  %v1100_v25 = vmax.f32 %v1068_v15, 0.0 }
 0x1e2   : > { %v1103_v23 = vmax.f32 %v1071_v17, 0.0 }
 0x1e3   : > { %v1101_v27 = vmax.f32 %v1069_v19, 0.0  ;;  %v2086_v28 = vpop.f32.mrb[28].mxu1  ;;  %v1951_v19 = vld [vmem:[%s2532_s17 + $0x68] sm:$0xff]  }
 0x1e4   : > { %v1035_v30 = vadd.f32 %v2086_v28, %v1825_v18  ;;  %v942_v31 = vpop.f32.mrb[29].mxu1  ;;  %v1129_v32 = vpack.c.bf16 %v1103_v23, %v1102_v22 }
 0x1e5   : > { %v1033_v33 = vadd.f32 %v1821_v21, %v942_v31  ;;  %v2087_v34 = vpop.f32.mrb[30].mxu1  ;;  %v1128_v35 = vpack.c.bf16 %v1101_v27, %v1100_v25 }
 0x1e6   : > { %v1074_v37 = vadd.f32 %v2539_v20, %v1035_v30  ;;  %v1036_v38 = vadd.f32 %v2087_v34, %v1826_v24  ;;  %v945_v39 = vpop.f32.mrb[31].mxu1  ;;  %v1950_v24 = vld [vmem:[%s2532_s17 + $0x60] sm:$0xff]   ;;  %v1850_v34 = vunpack.c.h.bf16 %v1951_v19 }
 0x1e7   : > { %v1072_v41 = vadd.f32 %v2539_v20, %v1033_v33  ;;  %v1034_v42 = vadd.f32 %v1822_v29, %v945_v39  ;;  %2128 = vmatprep.mubr.bf16.mxu0 %v1128_v35  ;;  %v1849_v29 = vunpack.c.l.bf16 %v1951_v19  ;;  %v1845_v31 = vunpack.c.l.bf16 %v1950_v24 }
 0x1e8   : > { %v1075_v43 = vadd.f32 %v2539_v20, %v1036_v38  ;;  %2129 = vmatmul.mubr.bf16.gmra.mrb[24].mxu0 %v1129_v32  ;;  %v1106_v47 = vmax.f32 %v1074_v37, 0.0  ;;  %v1846_v38 = vunpack.c.h.bf16 %v1950_v24 }
 0x1e9   : > { %v1073_v45 = vadd.f32 %v2539_v20, %v1034_v42  ;;  %v1104_v50 = vmax.f32 %v1072_v41, 0.0 }
 0x1ea   : > { %v1107_v48 = vmax.f32 %v1075_v43, 0.0 }
 0x1eb   : > { %v1105_v51 = vmax.f32 %v1073_v45, 0.0  ;;  %v2090_v52 = vpop.f32.mrb[32].mxu1  ;;  %v1953_v45 = vld [vmem:[%s2532_s17 + $0x78] sm:$0xff]  }
 0x1ec   : > { %v1039_v54 = vadd.f32 %v2090_v52, %v1833_v44  ;;  %v958_v55 = vpop.f32.mrb[33].mxu1  ;;  %v1131_v56 = vpack.c.bf16 %v1107_v48, %v1106_v47 }
 0x1ed   : > { %v1037_v57 = vadd.f32 %v1829_v46, %v958_v55  ;;  %v2091_v58 = vpop.f32.mrb[34].mxu1  ;;  %v1130_v59 = vpack.c.bf16 %v1105_v51, %v1104_v50 }
 0x1ee   : > { %v1078_v61 = vadd.f32 %v2539_v20, %v1039_v54  ;;  %v1040_v62 = vadd.f32 %v2091_v58, %v1834_v49  ;;  %v961_v63 = vpop.f32.mrb[35].mxu1  ;;  %v1952_v49 = vld [vmem:[%s2532_s17 + $0x70] sm:$0xff]   ;;  %v1858_v58 = vunpack.c.h.bf16 %v1953_v45  ;;  %s2226_s17 = scalar_lea.vmem %s2650_s26, 2048 }
 0x1ef   : > { %v1076_v1 = vadd.f32 %v2539_v20, %v1037_v57  ;;  %v1038_v3 = vadd.f32 %v1830_v53, %v961_v63  ;;  %2132 = vmatprep.mubr.bf16.mxu0 %v1130_v59  ;;  %v1857_v53 = vunpack.c.l.bf16 %v1953_v45  ;;  %v1853_v55 = vunpack.c.l.bf16 %v1952_v49  ;;  %p2227_p11 = scmp.ne.s32.totalorder %s2650_s26, %s2226_s17  ;;  %p2234_p1 = scmp.lt.s32.totalorder %s2232_s19, %s2226_s17 }
 0x1f0   : > { %v1079_v4 = vadd.f32 %v2539_v20, %v1040_v62  ;;  %2133 = vmatmul.mubr.bf16.gmra.mrb[28].mxu0 %v1131_v56  ;;  %v1110_v9 = vmax.f32 %v1078_v61, 0.0  ;;  %v1854_v62 = vunpack.c.h.bf16 %v1952_v49 }
 0x1f1   : > { %v1077_v7 = vadd.f32 %v2539_v20, %v1038_v3  ;;  %v1108_v12 = vmax.f32 %v1076_v1, 0.0  ;;  %p2228_p12 = pnand %p2227_p11, %p2376_p5  ;;  %p2235_p2 = por %p2234_p1, %p2233_p0 }
 0x1f2   : > { %v1111_v10 = vmax.f32 %v1079_v4, 0.0 }
 0x1f3   : > { %v1109_v13 = vmax.f32 %v1077_v7, 0.0  ;;  %v2094_v26 = vpop.f32.mrb[36].mxu1  ;;  %p2229_p13 = pneg %p2228_p12 }
 0x1f4   : > { %v1043_v5 = vadd.f32 %v2094_v26, %v1841_v6  ;;  %v974_v14 = vpop.f32.mrb[37].mxu1  ;;  %v1133_v15 = vpack.c.bf16 %v1111_v10, %v1110_v9 }
 0x1f5   : > { %v1041_v16 = vadd.f32 %v1837_v8, %v974_v14  ;;  %v2095_v17 = vpop.f32.mrb[38].mxu1  ;;  %v1132_v18 = vpack.c.bf16 %v1109_v13, %v1108_v12  ;;  %p2236_p3 = pnand %p2235_p2, %p2229_p13 }
 0x1f6   : > { %v1082_v21 = vadd.f32 %v2539_v20, %v1043_v5  ;;  %v1044_v22 = vadd.f32 %v2095_v17, %v1842_v11  ;;  %v977_v23 = vpop.f32.mrb[39].mxu1  ;;  %v2590_v17 = vld [vmem:[%s2704_s7] ss:$0 sm:$0xff] }
 0x1f7   : > { %v1080_v25 = vadd.f32 %v2539_v20, %v1041_v16  ;;  %v1042_v27 = vadd.f32 %v1838_v2, %v977_v23  ;;  %2136 = vmatprep.mubr.bf16.mxu0 %v1132_v18 }
 0x1f8   : > { %v1083_v28 = vadd.f32 %v2539_v20, %v1044_v22  ;;  %2137 = vmatmul.mubr.bf16.gmra.mrb[32].mxu0 %v1133_v15  ;;  %v1114_v32 = vmax.f32 %v1082_v21, 0.0 }
 0x1f9   : > { %v1081_v30 = vadd.f32 %v2539_v20, %v1042_v27  ;;  %v1112_v35 = vmax.f32 %v1080_v25, 0.0 }
 0x1fa   : > { %v1115_v33 = vmax.f32 %v1083_v28, 0.0 }
 0x1fb   : > { %v1113_v36 = vmax.f32 %v1081_v30, 0.0  ;;  %v2098_v37 = vpop.f32.mrb[40].mxu1 }
 0x1fc   : > { %v1047_v39 = vadd.f32 %v2098_v37, %v1849_v29  ;;  %v990_v40 = vpop.f32.mrb[41].mxu1  ;;  %v1135_v41 = vpack.c.bf16 %v1115_v33, %v1114_v32 }
 0x1fd   : > { %v1045_v42 = vadd.f32 %v1845_v31, %v990_v40  ;;  %v2099_v43 = vpop.f32.mrb[42].mxu1  ;;  %v1134_v44 = vpack.c.bf16 %v1113_v36, %v1112_v35 }
 0x1fe   : > { %v1086_v46 = vadd.f32 %v2539_v20, %v1047_v39  ;;  %v1048_v47 = vadd.f32 %v2099_v43, %v1850_v34  ;;  %v993_v48 = vpop.f32.mrb[43].mxu1 }
 0x1ff   : > { %v1084_v50 = vadd.f32 %v2539_v20, %v1045_v42  ;;  %v1046_v51 = vadd.f32 %v1846_v38, %v993_v48  ;;  %2140 = vmatprep.mubr.bf16.mxu0 %v1134_v44 }
 0x200   : > { %v1087_v52 = vadd.f32 %v2539_v20, %v1048_v47  ;;  %2141 = vmatmul.mubr.bf16.gmra.mrb[36].mxu0 %v1135_v41  ;;  %v1118_v56 = vmax.f32 %v1086_v46, 0.0 }
 0x201   : > { %v1085_v54 = vadd.f32 %v2539_v20, %v1046_v51  ;;  %v1116_v59 = vmax.f32 %v1084_v50, 0.0 }
 0x202   : > { %v1119_v57 = vmax.f32 %v1087_v52, 0.0 }
 0x203   : > { %v1117_v60 = vmax.f32 %v1085_v54, 0.0  ;;  %v2102_v61 = vpop.f32.mrb[44].mxu1 }
 0x204   : > { %v1051_v63 = vadd.f32 %v2102_v61, %v1857_v53  ;;  %v1006_v0 = vpop.f32.mrb[45].mxu1  ;;  %v1137_v1 = vpack.c.bf16 %v1119_v57, %v1118_v56 }
 0x205   : > { %v1049_v3 = vadd.f32 %v1853_v55, %v1006_v0  ;;  %v2103_v4 = vpop.f32.mrb[46].mxu1  ;;  %v1136_v6 = vpack.c.bf16 %v1117_v60, %v1116_v59 }
 0x206   : > { %v1090_v7 = vadd.f32 %v2539_v20, %v1051_v63  ;;  %v1052_v8 = vadd.f32 %v2103_v4, %v1858_v58  ;;  %v1009_v9 = vpop.f32.mrb[47].mxu1 }
 0x207   : > { %v1088_v10 = vadd.f32 %v2539_v20, %v1049_v3  ;;  %v1050_v11 = vadd.f32 %v1854_v62, %v1009_v9  ;;  %2144 = vmatprep.mubr.bf16.mxu0 %v1136_v6 }
 0x208   : > { %v1091_v12 = vadd.f32 %v2539_v20, %v1052_v8  ;;  %2145 = vmatmul.mubr.bf16.gmra.mrb[40].mxu0 %v1137_v1  ;;  %v1122_v26 = vmax.f32 %v1090_v7, 0.0 }
 0x209   : > { %v1089_v13 = vadd.f32 %v2539_v20, %v1050_v11  ;;  %v1120_v5 = vmax.f32 %v1088_v10, 0.0 }
 0x20a   : > { %v1123_v2 = vmax.f32 %v1091_v12, 0.0 }
 0x20b   : > { %v1121_v14 = vmax.f32 %v1089_v13, 0.0 }
 0x20c   : > { %v1139_v15 = vpack.c.bf16 %v1123_v2, %v1122_v26 }
 0x20d   : > { %v1138_v16 = vpack.c.bf16 %v1121_v14, %v1120_v5 }
 0x20f   : > { %2148 = vmatprep.mubr.bf16.mxu0 %v1138_v16 }
 0x210   : > { %2149 = vmatmul.mubr.bf16.gmra.mrb[44].mxu0 %v1139_v15 }
 0x2ab   : > { %v2122_v18 = vpop.f32.mrb[16].mxu0 }
 0x2ac   : > { %v1254_v19 = vadd.f32 %v2122_v18, %v2590_v17  ;;  %v1245_v21 = vpop.f32.mrb[17].mxu0 }
 0x2ad   : > { %v1246_v20 = vadd.f32 %v2590_v17, %v1245_v21  ;;  %v2123_v22 = vpop.f32.mrb[18].mxu0 }
 0x2ae   : > { %v1257_v23 = vadd.f32 %v2123_v22, %v2590_v17  ;;  %v1248_v24 = vpop.f32.mrb[19].mxu0  ;;  %v1374_v27 = vmax.f32 %v1254_v19, 0.0 }
 0x2af   : > { %v1249_v25 = vadd.f32 %v2590_v17, %v1248_v24  ;;  %v1372_v29 = vmax.f32 %v1246_v20, 0.0 }
 0x2b0   : > { %v1375_v28 = vmax.f32 %v1257_v23, 0.0 }
 0x2b1   : > { %v1373_v30 = vmax.f32 %v1249_v25, 0.0 }
 0x2b2   : > { %v1867_v31 = vpack.c.bf16 %v1375_v28, %v1374_v27 }
 0x2b3   : > { %v1862_v32 = vpack.c.bf16 %v1373_v30, %v1372_v29  ;;  %v2126_v33 = vpop.f32.mrb[20].mxu0 }
 0x2b4   : > { %1954 = vst [vmem:[%s2599_s23 + $0x8] sm:$0xff] %v1867_v31   ;;  %v1270_v34 = vadd.f32 %v2126_v33, %v2590_v17  ;;  %v1261_v35 = vpop.f32.mrb[21].mxu0 }
 0x2b5   : > { %1863 = vst [vmem:[%s2599_s23] sm:$0xff] %v1862_v32   ;;  %v1262_v36 = vadd.f32 %v2590_v17, %v1261_v35  ;;  %v2127_v37 = vpop.f32.mrb[22].mxu0 }
 0x2b6   : > { %v1273_v38 = vadd.f32 %v2127_v37, %v2590_v17  ;;  %v1264_v39 = vpop.f32.mrb[23].mxu0  ;;  %v1378_v41 = vmax.f32 %v1270_v34, 0.0 }
 0x2b7   : > { %v1265_v40 = vadd.f32 %v2590_v17, %v1264_v39  ;;  %v1376_v43 = vmax.f32 %v1262_v36, 0.0 }
 0x2b8   : > { %v1379_v42 = vmax.f32 %v1273_v38, 0.0 }
 0x2b9   : > { %v1377_v44 = vmax.f32 %v1265_v40, 0.0 }
 0x2ba   : > { %v1877_v45 = vpack.c.bf16 %v1379_v42, %v1378_v41 }
 0x2bb   : > { %v1872_v46 = vpack.c.bf16 %v1377_v44, %v1376_v43  ;;  %v2130_v47 = vpop.f32.mrb[24].mxu0 }
 0x2bc   : > { %1956 = vst [vmem:[%s2599_s23 + $0x18] sm:$0xff] %v1877_v45   ;;  %v1286_v48 = vadd.f32 %v2130_v47, %v2590_v17  ;;  %v1277_v49 = vpop.f32.mrb[25].mxu0 }
 0x2bd   : > { %1955 = vst [vmem:[%s2599_s23 + $0x10] sm:$0xff] %v1872_v46   ;;  %v1278_v50 = vadd.f32 %v2590_v17, %v1277_v49  ;;  %v2131_v51 = vpop.f32.mrb[26].mxu0 }
 0x2be   : > { %v1289_v52 = vadd.f32 %v2131_v51, %v2590_v17  ;;  %v1280_v53 = vpop.f32.mrb[27].mxu0  ;;  %v1382_v55 = vmax.f32 %v1286_v48, 0.0 }
 0x2bf   : > { %v1281_v54 = vadd.f32 %v2590_v17, %v1280_v53  ;;  %v1380_v57 = vmax.f32 %v1278_v50, 0.0 }
 0x2c0   : > { %v1383_v56 = vmax.f32 %v1289_v52, 0.0 }
 0x2c1   : > { %v1381_v58 = vmax.f32 %v1281_v54, 0.0 }
 0x2c2   : > { %v1887_v59 = vpack.c.bf16 %v1383_v56, %v1382_v55 }
 0x2c3   : > { %v1882_v60 = vpack.c.bf16 %v1381_v58, %v1380_v57  ;;  %v2134_v61 = vpop.f32.mrb[28].mxu0 }
 0x2c4   : > { %1958 = vst [vmem:[%s2599_s23 + $0x28] sm:$0xff] %v1887_v59   ;;  %v1302_v62 = vadd.f32 %v2134_v61, %v2590_v17  ;;  %v1293_v63 = vpop.f32.mrb[29].mxu0 }
 0x2c5   : > { %1957 = vst [vmem:[%s2599_s23 + $0x20] sm:$0xff] %v1882_v60   ;;  %v1294_v0 = vadd.f32 %v2590_v17, %v1293_v63  ;;  %v2135_v1 = vpop.f32.mrb[30].mxu0 }
 0x2c6   : > { %v1305_v3 = vadd.f32 %v2135_v1, %v2590_v17  ;;  %v1296_v4 = vpop.f32.mrb[31].mxu0  ;;  %v1386_v7 = vmax.f32 %v1302_v62, 0.0 }
 0x2c7   : > { %v1297_v6 = vadd.f32 %v2590_v17, %v1296_v4  ;;  %v1384_v9 = vmax.f32 %v1294_v0, 0.0 }
 0x2c8   : > { %v1387_v8 = vmax.f32 %v1305_v3, 0.0 }
 0x2c9   : > { %v1385_v10 = vmax.f32 %v1297_v6, 0.0 }
 0x2ca   : > { %v1897_v11 = vpack.c.bf16 %v1387_v8, %v1386_v7 }
 0x2cb   : > { %v1892_v12 = vpack.c.bf16 %v1385_v10, %v1384_v9  ;;  %v2138_v13 = vpop.f32.mrb[32].mxu0 }
 0x2cc   : > { %1960 = vst [vmem:[%s2599_s23 + $0x38] sm:$0xff] %v1897_v11   ;;  %v1318_v26 = vadd.f32 %v2138_v13, %v2590_v17  ;;  %v1309_v2 = vpop.f32.mrb[33].mxu0 }
 0x2cd   : > { %1959 = vst [vmem:[%s2599_s23 + $0x30] sm:$0xff] %v1892_v12   ;;  %v1310_v5 = vadd.f32 %v2590_v17, %v1309_v2  ;;  %v2139_v14 = vpop.f32.mrb[34].mxu0 }
 0x2ce   : > { %v1321_v15 = vadd.f32 %v2139_v14, %v2590_v17  ;;  %v1312_v16 = vpop.f32.mrb[35].mxu0  ;;  %v1390_v19 = vmax.f32 %v1318_v26, 0.0 }
 0x2cf   : > { %v1313_v18 = vadd.f32 %v2590_v17, %v1312_v16  ;;  %v1388_v20 = vmax.f32 %v1310_v5, 0.0 }
 0x2d0   : > { %v1391_v21 = vmax.f32 %v1321_v15, 0.0 }
 0x2d1   : > { %v1389_v22 = vmax.f32 %v1313_v18, 0.0 }
 0x2d2   : > { %v1907_v23 = vpack.c.bf16 %v1391_v21, %v1390_v19 }
 0x2d3   : > { %v1902_v24 = vpack.c.bf16 %v1389_v22, %v1388_v20  ;;  %v2142_v25 = vpop.f32.mrb[36].mxu0 }
 0x2d4   : > { %1962 = vst [vmem:[%s2599_s23 + $0x48] sm:$0xff] %v1907_v23   ;;  %v1334_v27 = vadd.f32 %v2142_v25, %v2590_v17  ;;  %v1325_v28 = vpop.f32.mrb[37].mxu0 }
 0x2d5   : > { %1961 = vst [vmem:[%s2599_s23 + $0x40] sm:$0xff] %v1902_v24   ;;  %v1326_v29 = vadd.f32 %v2590_v17, %v1325_v28  ;;  %v2143_v30 = vpop.f32.mrb[38].mxu0 }
 0x2d6   : > { %v1337_v31 = vadd.f32 %v2143_v30, %v2590_v17  ;;  %v1328_v32 = vpop.f32.mrb[39].mxu0  ;;  %v1394_v34 = vmax.f32 %v1334_v27, 0.0 }
 0x2d7   : > { %v1329_v33 = vadd.f32 %v2590_v17, %v1328_v32  ;;  %v1392_v36 = vmax.f32 %v1326_v29, 0.0 }
 0x2d8   : > { %v1395_v35 = vmax.f32 %v1337_v31, 0.0 }
 0x2d9   : > { %v1393_v37 = vmax.f32 %v1329_v33, 0.0 }
 0x2da   : > { %v1917_v38 = vpack.c.bf16 %v1395_v35, %v1394_v34 }
 0x2db   : > { %v1912_v39 = vpack.c.bf16 %v1393_v37, %v1392_v36  ;;  %v2146_v40 = vpop.f32.mrb[40].mxu0 }
 0x2dc   : > { %1964 = vst [vmem:[%s2599_s23 + $0x58] sm:$0xff] %v1917_v38   ;;  %v1350_v41 = vadd.f32 %v2146_v40, %v2590_v17  ;;  %v1341_v42 = vpop.f32.mrb[41].mxu0 }
 0x2dd   : > { %1963 = vst [vmem:[%s2599_s23 + $0x50] sm:$0xff] %v1912_v39   ;;  %v1342_v43 = vadd.f32 %v2590_v17, %v1341_v42  ;;  %v2147_v44 = vpop.f32.mrb[42].mxu0 }
 0x2de   : > { %v1353_v45 = vadd.f32 %v2147_v44, %v2590_v17  ;;  %v1344_v46 = vpop.f32.mrb[43].mxu0  ;;  %v1398_v48 = vmax.f32 %v1350_v41, 0.0 }
 0x2df   : > { %v1345_v47 = vadd.f32 %v2590_v17, %v1344_v46  ;;  %v1396_v50 = vmax.f32 %v1342_v43, 0.0 }
 0x2e0   : > { %v1399_v49 = vmax.f32 %v1353_v45, 0.0 }
 0x2e1   : > { %v1397_v51 = vmax.f32 %v1345_v47, 0.0 }
 0x2e2   : > { %v1927_v52 = vpack.c.bf16 %v1399_v49, %v1398_v48 }
 0x2e3   : > { %v1922_v53 = vpack.c.bf16 %v1397_v51, %v1396_v50  ;;  %v2150_v54 = vpop.f32.mrb[44].mxu0 }
 0x2e4   : > { %1966 = vst [vmem:[%s2599_s23 + $0x68] sm:$0xff] %v1927_v52   ;;  %v1366_v55 = vadd.f32 %v2150_v54, %v2590_v17  ;;  %v1357_v56 = vpop.f32.mrb[45].mxu0 }
 0x2e5   : > { %1965 = vst [vmem:[%s2599_s23 + $0x60] sm:$0xff] %v1922_v53   ;;  %v1358_v57 = vadd.f32 %v2590_v17, %v1357_v56  ;;  %v2151_v58 = vpop.f32.mrb[46].mxu0 }
 0x2e6   : > { %v1369_v59 = vadd.f32 %v2151_v58, %v2590_v17  ;;  %v1360_v60 = vpop.f32.mrb[47].mxu0  ;;  %v1402_v62 = vmax.f32 %v1366_v55, 0.0 }
 0x2e7   : > { %v1361_v61 = vadd.f32 %v2590_v17, %v1360_v60  ;;  %v1400_v0 = vmax.f32 %v1358_v57, 0.0 }
 0x2e8   : > { %v1403_v63 = vmax.f32 %v1369_v59, 0.0 }
 0x2e9   : > { %v1401_v1 = vmax.f32 %v1361_v61, 0.0 }
 0x2ea   : > { %v1937_v3 = vpack.c.bf16 %v1403_v63, %v1402_v62 }
 0x2eb   : > { %v1932_v4 = vpack.c.bf16 %v1401_v1, %v1400_v0 }
 0x2ec   : > { %1968 = vst [vmem:[%s2599_s23 + $0x78] sm:$0xff] %v1937_v3  }
 0x2ed   : > { %1967 = vst [vmem:[%s2599_s23 + $0x70] sm:$0xff] %v1932_v4  }
 0x2ee   : > { %2239 = shalt.err (!%p2236_p3)
}
 0x2ef   : > { %s2240_s24 = scalar_lea.hbm %s2648_s13, 2048  ;;  %s2244_s23 = scalar_lea.hbm %s2705_s8, 4096 }
 0x2f0   : > { %p2241_p4 = scmp.ne.s32.totalorder %s2648_s13, %s2240_s24  ;;  %p2245_p9 = scmp.lt.u32.totalorder %s2648_s13, %s2705_s8 }
 0x2f1   : > { %p2246_p10 = scmp.lt.u32.totalorder %s2244_s23, %s2240_s24  ;;  %p2248_p12 = scmp.lt.u32.totalorder %s2240_s24, %s2648_s13 }
 0x2f2   : > { %p2242_p7 = pnand %p2241_p4, %p2376_p5 }
 0x2f3   : > { %p2247_p11 = por %p2246_p10, %p2245_p9 }
 0x2f4   : > { %p2243_p8 = pneg %p2242_p7 }
 0x2f5   : > { %p2249_p13 = por %p2248_p12, %p2247_p11 }
 0x2f7   : > { %p2250_p0 = pnand %p2249_p13, %p2243_p8 }
 0x2f9   : > { %2253 = shalt.err (!%p2250_p0)
}
 0x2fa   : > { %s2291_s12 = smov 64   ;;  %s2292_s17 = smov 4  }
 0x2fb   : > { %2156 = dma.vmem_to_hbm [thread:$0]  (%p2376_p5), %s2650_s26, 2048, %s2648_s13, %s2656_s9, %s2291_s12, %s2291_s12, %s2292_s17  }
 0x2fc PF: > { %p2162_p1 = scmp.ge.s32.totalorder %s2288_s30, 2  ;;  %s1593_s18 = sand.u32 1, %s2276_s27  }
 0x2fd   : > { %s1594_s20 = scalar_lea.sflag [#allocation3], %s1593_s18 }
 0x2fe   : > { %p2159_p2 = pnand %p2162_p1, %p2380_p6 }
 0x300   : > { %2271 = dma.done.wait (!%p2159_p2), %s1594_s20, 2048  }
 0x301   : > { %2273 = vsyncadd (!%p2159_p2), %s1594_s20, 4294965248  ;;  %p18_p3 = scmp.ge.s32.totalorder %s2363_s11, 4   ;;  %s2708_s27 = smov %s2280_s28 }
 0x302   : > { %s2709_s28 = smov %s2284_s29  ;;  %s2710_s29 = smov %s2374_s14 }
 0x303   : > { %s2711_s30 = smov %s2363_s11  ;;  %20 = sbr.rel (!%p18_p3) target bundleno = 3 (0x3), region = 90 }
 0x30a   :  { %1599 = vsyncpa [#allocation3], 1 }
 0x30b   :  { %1601 = vsyncpa [#allocation3 + $0x1], 1 }

</bundles_post_ra>
